<compile_context>
chip_gen: v5e
topology: v5e:2x2
jax: 0.10.0
libtpu: 0.0.40
codegen_flags: <defaults>
</compile_context>

<pallas_src>
import jax
import jax.numpy as jnp
from jax.experimental import pallas as pl
from jax.experimental.pallas import tpu as pltpu

C_IN = 2
L_IN = 9
K = 3
C_OUT = 16
L_OUT = L_IN - K + 1            # 7
X_FLAT = C_IN * L_IN            # 18
FC1_IN = C_OUT * L_OUT          # 112
FC1_OUT = 32
LANE = 128


def _round_up(n, m):
    return ((n + m - 1) // m) * m


def cnn_kernel(x_ref, wbig_ref, bbig_ref, wfc1_ref, bfc1_ref,
               wfc2_ref, bfc2_ref, out_ref):
    # x_ref:    (TB, 18)        f32 or bf16   flattened NCL input
    # wbig_ref: (18, 112)       f32 or bf16   conv folded into a dense weight
    # bbig_ref: (1, 112)        f32           conv bias tiled per position
    # wfc1_ref: (112, 32)       f32 or bf16
    # bfc1_ref: (1, 32)         f32
    # wfc2_ref: (32, A_out)     f32 or bf16
    # bfc2_ref: (1, A_out)      f32
    # out_ref:  (TB, A_out)     f32
    h = jnp.dot(x_ref[...], wbig_ref[...],
                preferred_element_type=jnp.float32)
    h = jnp.maximum(h + bbig_ref[...], 0.0)                      # (TB, 112) f32
    h = jnp.dot(h.astype(wfc1_ref.dtype), wfc1_ref[...],
                preferred_element_type=jnp.float32)
    h = jnp.maximum(h + bfc1_ref[...], 0.0)                      # (TB, 32) f32
    h = jnp.dot(h.astype(wfc2_ref.dtype), wfc2_ref[...],
                preferred_element_type=jnp.float32) + bfc2_ref[...]
    out_ref[...] = h.astype(out_ref.dtype)


def _fold_conv_into_matmul(w_conv, b_conv):
    """Build W_big (18,112), b_big (1,112) s.t. relu(x_flat @ W_big + b_big)
    equals PyTorch's relu(conv1d(x)).view(B,-1) (column order c*7 + l)."""
    c = jnp.arange(C_OUT)
    ci = jnp.arange(C_IN)
    k = jnp.arange(K)
    l = jnp.arange(L_OUT)
    rows = (ci[None, :, None, None] * L_IN
            + l[None, None, None, :] + k[None, None, :, None])    # (1,CI,K,LO)
    rows = jnp.broadcast_to(rows, (C_OUT, C_IN, K, L_OUT))
    cols = jnp.broadcast_to(
        c[:, None, None, None] * L_OUT + l[None, None, None, :],
        (C_OUT, C_IN, K, L_OUT))
    vals = jnp.broadcast_to(w_conv[:, :, :, None].astype(jnp.float32),
                            (C_OUT, C_IN, K, L_OUT))
    w_big = jnp.zeros((X_FLAT, FC1_IN), jnp.float32).at[
        rows.reshape(-1), cols.reshape(-1)].set(vals.reshape(-1))
    b_big = jnp.repeat(b_conv.astype(jnp.float32), L_OUT).reshape(1, FC1_IN)
    return w_big, b_big


def cnn_forward(x, params, *, block_b=4096, compute_dtype=jnp.float32):
    """x: (B, 2, 9) float32. Returns q_values (B, num_actions) in float32.

    compute_dtype=jnp.bfloat16 halves streamed input/weight bytes and uses the
    bf16-native MXU on v6e/v7x; accumulation stays f32.
    """
    w_conv, b_conv, w_fc1, b_fc1, w_fc2, b_fc2 = params
    B = x.shape[0]
    A = w_fc2.shape[0]
    cdt = jnp.dtype(compute_dtype)

    # Small A: emit the kernel output as (B_pad, A) directly (last dim equals
    # the full array dim, so the 128-lane BlockSpec constraint doesn't apply).
    # Masked VMEM stores are far cheaper than 128/A x wasted HBM writeback.
    A_out = A if A < 64 else _round_up(A, LANE)

    # ---- one-time parameter glue (outside the kernel) ----
    w_big, b_big = _fold_conv_into_matmul(w_conv, b_conv)      # (18,112),(1,112)
    wfc1_t = w_fc1.T.astype(jnp.float32)                       # (112, 32)
    bfc1_2d = b_fc1.reshape(1, FC1_OUT).astype(jnp.float32)
    wfc2_t = jnp.zeros((FC1_OUT, A_out), jnp.float32).at[:, :A].set(
        w_fc2.T.astype(jnp.float32))                           # (32, A_out)
    bfc2_2d = jnp.zeros((1, A_out), jnp.float32).at[:, :A].set(
        b_fc2.astype(jnp.float32))
    # Weights/x in the compute dtype; biases stay f32 (added to the f32 acc).
    w_big = w_big.astype(cdt)
    wfc1_t = wfc1_t.astype(cdt)
    wfc2_t = wfc2_t.astype(cdt)

    # ---- adaptive batch tiling ----
    # Minimal padding; >=2 tiles when B>=16 so v7x's two TensorCores both get
    # work (extra grid step is ~0.35 us on single-TC v5e/v6e — negligible).
    min_grid = 2 if B >= 16 else 1
    num_tiles = max(pl.cdiv(B, block_b), min_grid)
    TB = _round_up(pl.cdiv(B, num_tiles), 8)
    B_pad = _round_up(B, TB)
    grid = (B_pad // TB,)

    x2 = x.reshape(B, X_FLAT).astype(cdt)
    if B_pad != B:
        x2 = jnp.pad(x2, ((0, B_pad - B), (0, 0)))

    # ---- advisory cost estimate for the XLA scheduler ----
    w_elems = X_FLAT * FC1_IN + FC1_IN * FC1_OUT + FC1_OUT * A_out
    cost = pl.CostEstimate(
        flops=int(2 * B_pad * w_elems),
        transcendentals=0,
        bytes_accessed=int(B_pad * (X_FLAT * cdt.itemsize + A_out * 4)
                           + w_elems * cdt.itemsize
                           + (FC1_IN + FC1_OUT + A_out) * 4))

    const = lambda i: (0, 0)
    out = pl.pallas_call(
        cnn_kernel,
        out_shape=jax.ShapeDtypeStruct((B_pad, A_out), jnp.float32),
        grid=grid,
        in_specs=[
            pl.BlockSpec((TB, X_FLAT), lambda i: (i, 0)),      # streamed input
            pl.BlockSpec((X_FLAT, FC1_IN), const),             # VMEM-resident weights
            pl.BlockSpec((1, FC1_IN), const),
            pl.BlockSpec((FC1_IN, FC1_OUT), const),
            pl.BlockSpec((1, FC1_OUT), const),
            pl.BlockSpec((FC1_OUT, A_out), const),
            pl.BlockSpec((1, A_out), const),
        ],
        out_specs=pl.BlockSpec((TB, A_out), lambda i: (i, 0)),
        compiler_params=pltpu.CompilerParams(
            dimension_semantics=("parallel",),
            # v5e's default scoped-VMEM limit is only 16 MiB; a TB=4096 f32
            # tile chain needs ~12-14 MiB, so raise the limit explicitly
            # (48 MiB is still below v7x's 64 MiB physical VMEM).
            vmem_limit_bytes=48 * 1024 * 1024),
        cost_estimate=cost,
    )(x2, w_big, b_big, wfc1_t, bfc1_2d, wfc2_t, bfc2_2d)

    # With adaptive tiling the row slice copies at most a tiny array; skip it
    # entirely when there is no padding.
    if B_pad != B:
        out = out[:B]
    if A_out != A:
        out = out[:, :A]
    return out


def init_params(key, num_actions):
    """Deterministic init mimicking PyTorch's default uniform(-1/sqrt(fan_in))."""
    ks = jax.random.split(key, 6)

    def u(k, shape, fan_in):
        bound = 1.0 / jnp.sqrt(float(fan_in))
        return jax.random.uniform(k, shape, jnp.float32, -bound, bound)

    w_conv = u(ks[0], (C_OUT, C_IN, K), C_IN * K)
    b_conv = u(ks[1], (C_OUT,), C_IN * K)
    w_fc1 = u(ks[2], (FC1_OUT, FC1_IN), FC1_IN)
    b_fc1 = u(ks[3], (FC1_OUT,), FC1_IN)
    w_fc2 = u(ks[4], (num_actions, FC1_OUT), FC1_OUT)
    b_fc2 = u(ks[5], (num_actions,), FC1_OUT)
    return (w_conv, b_conv, w_fc1, b_fc1, w_fc2, b_fc2)


def ref_forward(x, params):
    """Pure-JAX reference matching the PyTorch forward exactly."""
    w_conv, b_conv, w_fc1, b_fc1, w_fc2, b_fc2 = params
    B = x.shape[0]
    cols = jnp.stack(
        [x[:, ci, k:k + L_OUT] for ci in range(C_IN) for k in range(K)],
        axis=1,
    )  # (B, 6, 7)
    conv = jnp.einsum('bjl,cj->bcl', cols,
                      w_conv.reshape(C_OUT, C_IN * K)) + b_conv[None, :, None]
    h = jax.nn.relu(conv)                       # (B, 16, 7)  == PyTorch NCL
    flat = h.reshape(B, -1)                     # PyTorch x.view(B, -1)
    z1 = jax.nn.relu(flat @ w_fc1.T + b_fc1)
    return z1 @ w_fc2.T + b_fc2


if __name__ == "__main__":
    num_actions = 4

    key = jax.random.PRNGKey(0)
    k_param, k_x1, k_x2 = jax.random.split(key, 3)
    params = init_params(k_param, num_actions)

    # Primary small case: B=2, (B, 2, 9) input as implied by the module.
    x_small = jax.random.normal(k_x1, (2, C_IN, L_IN), jnp.float32)
    q = jax.block_until_ready(cnn_forward(x_small, params))
    q_ref = ref_forward(x_small, params)
    assert q.shape == (2, num_actions)
    assert jnp.allclose(q, q_ref, atol=1e-4, rtol=1e-4), (q, q_ref)

    # Exercise adaptive tiling (2 grid steps + row padding) in f32.
    x_med = jax.random.normal(k_x2, (37, C_IN, L_IN), jnp.float32)
    q_med = jax.block_until_ready(cnn_forward(x_med, params))
    q_med_ref = ref_forward(x_med, params)
    assert q_med.shape == (37, num_actions)
    assert jnp.allclose(q_med, q_med_ref, atol=1e-4, rtol=1e-4)

    # bf16 operand fast path (v6e/v7x byte reduction); f32 accumulation keeps
    # the result within a loose tolerance of the f32 reference.
    q_bf16 = jax.block_until_ready(
        cnn_forward(x_med, params, compute_dtype=jnp.bfloat16))
    assert q_bf16.shape == (37, num_actions)
    assert jnp.allclose(q_bf16, q_med_ref, atol=5e-2, rtol=5e-2)

    print("KERNEL_OK")
</pallas_src>

<mosaic_0001>
module attributes {stable_mosaic.version = 11 : i64} {
  func.func @cnn_kernel(%arg0: i32, %arg1: memref<8x18xf32, #tpu.memory_space<vmem>>, %arg2: memref<18x112xf32, #tpu.memory_space<vmem>>, %arg3: memref<1x112xf32, #tpu.memory_space<vmem>>, %arg4: memref<112x32xf32, #tpu.memory_space<vmem>>, %arg5: memref<1x32xf32, #tpu.memory_space<vmem>>, %arg6: memref<32x4xf32, #tpu.memory_space<vmem>>, %arg7: memref<1x4xf32, #tpu.memory_space<vmem>>, %arg8: memref<8x4xf32, #tpu.memory_space<vmem>>) attributes {dimension_semantics = [#tpu.dimension_semantics<parallel>], iteration_bounds = array<i64: 1>, scalar_prefetch = 0 : i64, scratch_operands = 0 : i64, tpu.core_type = #tpu.core_type<tc>, window_params = [{transform_indices = @transform_0, window_bounds = array<i64: 8, 18>}, {pipeline_mode = #tpu.pipeline_mode<synchronous>, transform_indices = @transform_1, window_bounds = array<i64: 18, 112>}, {pipeline_mode = #tpu.pipeline_mode<synchronous>, transform_indices = @transform_2, window_bounds = array<i64: 1, 112>}, {pipeline_mode = #tpu.pipeline_mode<synchronous>, transform_indices = @transform_3, window_bounds = array<i64: 112, 32>}, {pipeline_mode = #tpu.pipeline_mode<synchronous>, transform_indices = @transform_4, window_bounds = array<i64: 1, 32>}, {pipeline_mode = #tpu.pipeline_mode<synchronous>, transform_indices = @transform_5, window_bounds = array<i64: 32, 4>}, {pipeline_mode = #tpu.pipeline_mode<synchronous>, transform_indices = @transform_6, window_bounds = array<i64: 1, 4>}, {transform_indices = @transform_7, window_bounds = array<i64: 8, 4>}]} {
    %c0 = arith.constant 0 : index
    %c0_0 = arith.constant 0 : index
    %0 = vector.load %arg1[%c0, %c0_0] : memref<8x18xf32, #tpu.memory_space<vmem>>, vector<8x18xf32>
    %c0_1 = arith.constant 0 : index
    %c0_2 = arith.constant 0 : index
    %1 = vector.load %arg2[%c0_1, %c0_2] : memref<18x112xf32, #tpu.memory_space<vmem>>, vector<18x112xf32>
    %cst = arith.constant dense<0.000000e+00> : vector<8x112xf32>
    %2 = tpu.matmul %0, %1, %cst {dimension_numbers = #tpu.dot_dimension_numbers<[1], [0], [0], [1], [0, 0, 1, 1], [], []>} : vector<8x18xf32>, vector<18x112xf32>, vector<8x112xf32> -> vector<8x112xf32>
    %c0_3 = arith.constant 0 : index
    %c0_4 = arith.constant 0 : index
    %3 = vector.load %arg3[%c0_3, %c0_4] : memref<1x112xf32, #tpu.memory_space<vmem>>, vector<1x112xf32>
    %4 = vector.broadcast %3 : vector<1x112xf32> to vector<8x112xf32>
    %5 = arith.addf %2, %4 : vector<8x112xf32>
    %cst_5 = arith.constant 0.000000e+00 : f32
    %6 = vector.broadcast %cst_5 : f32 to vector<8x112xf32>
    %7 = arith.maximumf %5, %6 : vector<8x112xf32>
    %c0_6 = arith.constant 0 : index
    %c0_7 = arith.constant 0 : index
    %8 = vector.load %arg4[%c0_6, %c0_7] : memref<112x32xf32, #tpu.memory_space<vmem>>, vector<112x32xf32>
    %cst_8 = arith.constant dense<0.000000e+00> : vector<8x32xf32>
    %9 = tpu.matmul %7, %8, %cst_8 {dimension_numbers = #tpu.dot_dimension_numbers<[1], [0], [0], [1], [0, 0, 1, 1], [], []>} : vector<8x112xf32>, vector<112x32xf32>, vector<8x32xf32> -> vector<8x32xf32>
    %c0_9 = arith.constant 0 : index
    %c0_10 = arith.constant 0 : index
    %10 = vector.load %arg5[%c0_9, %c0_10] : memref<1x32xf32, #tpu.memory_space<vmem>>, vector<1x32xf32>
    %11 = vector.broadcast %10 : vector<1x32xf32> to vector<8x32xf32>
    %12 = arith.addf %9, %11 : vector<8x32xf32>
    %cst_11 = arith.constant 0.000000e+00 : f32
    %13 = vector.broadcast %cst_11 : f32 to vector<8x32xf32>
    %14 = arith.maximumf %12, %13 : vector<8x32xf32>
    %c0_12 = arith.constant 0 : index
    %c0_13 = arith.constant 0 : index
    %15 = vector.load %arg6[%c0_12, %c0_13] : memref<32x4xf32, #tpu.memory_space<vmem>>, vector<32x4xf32>
    %cst_14 = arith.constant dense<0.000000e+00> : vector<8x4xf32>
    %16 = tpu.matmul %14, %15, %cst_14 {dimension_numbers = #tpu.dot_dimension_numbers<[1], [0], [0], [1], [0, 0, 1, 1], [], []>} : vector<8x32xf32>, vector<32x4xf32>, vector<8x4xf32> -> vector<8x4xf32>
    %c0_15 = arith.constant 0 : index
    %c0_16 = arith.constant 0 : index
    %17 = vector.load %arg7[%c0_15, %c0_16] : memref<1x4xf32, #tpu.memory_space<vmem>>, vector<1x4xf32>
    %18 = vector.broadcast %17 : vector<1x4xf32> to vector<8x4xf32>
    %19 = arith.addf %16, %18 : vector<8x4xf32>
    %c0_17 = arith.constant 0 : index
    %c0_18 = arith.constant 0 : index
    %20 = vector.load %arg8[%c0_17, %c0_18] : memref<8x4xf32, #tpu.memory_space<vmem>>, vector<8x4xf32>
    tpu.vector_store %arg8[%c0_17, %c0_18], %19 {strides = array<i32>} : memref<8x4xf32, #tpu.memory_space<vmem>>, vector<8x4xf32>,
    return
  }
  func.func @transform_0(%arg0: i32) -> (i32, i32) {
    %c0_i32 = arith.constant 0 : i32
    %c0_i32_0 = arith.constant 0 : i32
    return %arg0, %c0_i32 : i32, i32
  }
  func.func @transform_1(%arg0: i32) -> (i32, i32) {
    %c0_i32 = arith.constant 0 : i32
    %c0_i32_0 = arith.constant 0 : i32
    %c0_i32_1 = arith.constant 0 : i32
    return %c0_i32, %c0_i32_0 : i32, i32
  }
  func.func @transform_2(%arg0: i32) -> (i32, i32) {
    %c0_i32 = arith.constant 0 : i32
    %c0_i32_0 = arith.constant 0 : i32
    %c0_i32_1 = arith.constant 0 : i32
    return %c0_i32, %c0_i32_0 : i32, i32
  }
  func.func @transform_3(%arg0: i32) -> (i32, i32) {
    %c0_i32 = arith.constant 0 : i32
    %c0_i32_0 = arith.constant 0 : i32
    %c0_i32_1 = arith.constant 0 : i32
    return %c0_i32, %c0_i32_0 : i32, i32
  }
  func.func @transform_4(%arg0: i32) -> (i32, i32) {
    %c0_i32 = arith.constant 0 : i32
    %c0_i32_0 = arith.constant 0 : i32
    %c0_i32_1 = arith.constant 0 : i32
    return %c0_i32, %c0_i32_0 : i32, i32
  }
  func.func @transform_5(%arg0: i32) -> (i32, i32) {
    %c0_i32 = arith.constant 0 : i32
    %c0_i32_0 = arith.constant 0 : i32
    %c0_i32_1 = arith.constant 0 : i32
    return %c0_i32, %c0_i32_0 : i32, i32
  }
  func.func @transform_6(%arg0: i32) -> (i32, i32) {
    %c0_i32 = arith.constant 0 : i32
    %c0_i32_0 = arith.constant 0 : i32
    %c0_i32_1 = arith.constant 0 : i32
    return %c0_i32, %c0_i32_0 : i32, i32
  }
  func.func @transform_7(%arg0: i32) -> (i32, i32) {
    %c0_i32 = arith.constant 0 : i32
    %c0_i32_0 = arith.constant 0 : i32
    return %arg0, %c0_i32 : i32, i32
  }
}

</mosaic_0001>

<bundles_post_ra>
// kernel: tpu_custom_call.1
= control target key start
LH: loop header
LB: loop body
LE: loop exit
PB: predicated region body
PF: predicated region fallthrough
CT: control target
= control target key end

     0   :  { %vm38_vm0 = vcmask 1041408   ;;  %vm34_vm1 = vcmask 146432   ;;  %vm81_vm2 = vcmask 916480   ;;  %vm114_vm3 = vcmask 261120   ;;  %s269_s1 = inlined_call_operand.vmem [shape: f32[18,112], index: 1, kind: input, shape index: {}]   ;;  %s270_s3 = inlined_call_operand.vmem [shape: f32[112,32], index: 3, kind: input, shape index: {}]   ;;  %s271_s0 = inlined_call_operand.vmem [shape: f32[8,18], index: 0, kind: input, shape index: {}]   ;;  %s272_s2 = inlined_call_operand.vmem [shape: f32[1,112], index: 2, kind: input, shape index: {}]   ;;  %s273_s4 = inlined_call_operand.vmem [shape: f32[1,32], index: 4, kind: input, shape index: {}]   ;;  %s274_s5 = inlined_call_operand.vmem [shape: f32[32,4], index: 5, kind: input, shape index: {}]   ;;  %s275_s6 = inlined_call_operand.vmem [shape: f32[1,4], index: 6, kind: input, shape index: {}]   ;;  %s276_s7 = inlined_call_operand.vmem [shape: f32[8,4], index: 7, kind: output, shape index: {}]  }
   0x1   :  { %v29_v0 = vld [vmem:[%s269_s1 + $0x10] sm:$0x3]  ;;  %v28_v1 = vld [vmem:[%s269_s1 + $0x8] sm:$0xff]  ;;  %v75_v3 = vld [vmem:[%s270_s3 + $0x60] sm:$0xff]  ;;  %vm138_vm4 = vcmask 31744  }
   0x2   :  { %144 = vmatpush.msk.msra.mxu0 %vm38_vm0, %v29_v0  ;;  %v76_v2 = vld [vmem:[%s270_s3 + $0x68] sm:$0xff]  ;;  %v27_v4 = vld [vmem:[%s269_s1] sm:$0xff]  ;;  %v74_v6 = vld [vmem:[%s270_s3 + $0x58] sm:$0xff] }
   0x3   :  { %87 = vmatpush.msra.mxu1 %v76_v2  ;;  %v26_v5 = vld [vmem:[%s271_s0] sm:$0xff]  ;;  %v73_v7 = vld [vmem:[%s270_s3 + $0x50] sm:$0xff]  ;;  %v72_v8 = vld [vmem:[%s270_s3 + $0x48] sm:$0xff] }
   0x4   :  { %56 = vmatpush.msra.mxu0 %v28_v1  ;;  %v71_v9 = vld [vmem:[%s270_s3 + $0x40] sm:$0xff]  ;;  %v70_v10 = vld [vmem:[%s270_s3 + $0x38] sm:$0xff]  ;;  %v69_v11 = vld [vmem:[%s270_s3 + $0x30] sm:$0xff] }
   0x5   :  { %88 = vmatpush.msra.mxu1 %v75_v3  ;;  %v68_v12 = vld [vmem:[%s270_s3 + $0x28] sm:$0xff]  ;;  %v67_v13 = vld [vmem:[%s270_s3 + $0x20] sm:$0xff]  ;;  %v66_v14 = vld [vmem:[%s270_s3 + $0x18] sm:$0xff] }
   0x6   :  { %57 = vmatpush.msra.mxu0 %v27_v4  ;;  %v65_v15 = vld [vmem:[%s270_s3 + $0x10] sm:$0xff]  ;;  %v64_v16 = vld [vmem:[%s270_s3 + $0x8] sm:$0xff]  ;;  %v63_v17 = vld [vmem:[%s270_s3] sm:$0xff] }
   0x7   :  { %145 = vmatmul.msk.f32.vlgmr.msra.gmra.mxu0 %vm34_vm1, %v26_v5  ;;  %89 = vmatpush.msra.mxu1 %v74_v6  ;;  %v109_v18 = vld [vmem:[%s274_s5 + $0x18] sm:$0xff]  ;;  %v148_v19 = vld [vmem:[%s272_s2] ss:$0 sm:$0xff]  ;;  %v108_v23 = vld [vmem:[%s274_s5 + $0x10] sm:$0xff] }
   0x8   :  { %130 = vmatpush.msra.mxu2 %v109_v18  ;;  %v107_v24 = vld [vmem:[%s274_s5 + $0x8] sm:$0xff]  ;;  %v106_v25 = vld [vmem:[%s274_s5] sm:$0xff] }
   0x9   :  { %90 = vmatpush.msra.mxu1 %v73_v7  ;;  %v149_v26 = vld [vmem:[%s273_s4] ss:$0 sm:$0xff] }
   0xa   :  { %131 = vmatpush.msra.mxu2 %v108_v23  ;;  %v150_v30 = vld [vmem:[%s275_s6] ss:$0 sm:$0xff] }
   0xb   :  { %91 = vmatpush.msra.mxu1 %v72_v8 }
   0xc   :  { %132 = vmatpush.msra.mxu2 %v107_v24 }
   0xd   :  { %92 = vmatpush.msra.mxu1 %v71_v9 }
   0xe   :  { %133 = vmatpush.msra.mxu2 %v106_v25 }
   0xf   :  { %93 = vmatpush.msra.mxu1 %v70_v10 }
  0x11   :  { %94 = vmatpush.msra.mxu1 %v69_v11 }
  0x13   :  { %95 = vmatpush.msra.mxu1 %v68_v12 }
  0x15   :  { %96 = vmatpush.msra.mxu1 %v67_v13 }
  0x17   :  { %97 = vmatpush.msra.mxu1 %v66_v14 }
  0x19   :  { %98 = vmatpush.msra.mxu1 %v65_v15 }
  0x1b   :  { %99 = vmatpush.msra.mxu1 %v64_v16 }
  0x1d   :  { %100 = vmatpush.msra.mxu1 %v63_v17 }
  0x84   :  { %v59_v20 = vpop.f32.mrf.mxu0 }
  0x85   :  { %v60_v21 = vadd.f32 %v148_v19, %v59_v20 }
  0x87   :  { %v62_v22 = vmax.f32 %v60_v21, 0.0 }
  0x89   :  { %146 = vmatmul.msk.f32.vlgmr.msra.gmra.mxu1 %vm81_vm2, %v62_v22 }
 0x106   :  { %v102_v27 = vpop.f32.mrf.mxu1 }
 0x107   :  { %v103_v28 = vadd.f32 %v149_v26, %v102_v27 }
 0x109   :  { %v105_v29 = vmax.f32 %v103_v28, 0.0 }
 0x10b   :  { %147 = vmatmul.msk.f32.vlgmr.msra.gmra.mxu2 %vm114_vm3, %v105_v29 }
 0x18e   :  { %v135_v31 = vpop.f32.mrf.mxu2 }
 0x18f   :  { %v136_v32 = vadd.f32 %v150_v30, %v135_v31 }
 0x191   :  { %139 = vst.msk [vmem:[%s276_s7] sm:$0xff] %vm138_vm4, %v136_v32 }

</bundles_post_ra>
